<compile_context>
chip_gen: v5e
topology: v5e:2x2
jax: 0.10.0
libtpu: 0.0.40
codegen_flags: <defaults>
</compile_context>

<pallas_src>
import functools

import jax
import jax.numpy as jnp
from jax.experimental import pallas as pl
from jax.experimental.pallas import tpu as pltpu


# --------------------------------------------------------------------------- #
# Kernel
# --------------------------------------------------------------------------- #
def _conv3d_bn_relu_kernel(x_ref, w_ref, shift_ref, o_ref, *, cin, kt, tt):
    # x_ref:     (1, Tp_rows*cin, hw_blk)   flattened padded-time window for this (b, hw) block
    # w_ref:     (tt*Cout, (tt+kt-1)*cin)   block-banded, BN-scale-folded weights
    # shift_ref: (tt*Cout, 1)               folded BN shift (includes conv bias), f32
    # o_ref:     (1, tt*Cout, hw_blk)       sublane/lane-dense output slab
    tb = pl.program_id(2)
    start = pl.multiple_of(tb * (tt * cin), cin)
    xs = x_ref[0, pl.ds(start, (tt + kt - 1) * cin), :]          # ((tt+kt-1)*cin, hw_blk)
    acc = jnp.dot(w_ref[...], xs, preferred_element_type=jnp.float32)
    y = jnp.maximum(acc + shift_ref[...], 0.0)                   # single f32 epilogue
    o_ref[0] = y.astype(o_ref.dtype)


# --------------------------------------------------------------------------- #
# Helpers
# --------------------------------------------------------------------------- #
def _round_up(a, b):
    return ((a + b - 1) // b) * b


def _cdiv(a, b):
    return -(-a // b)


def _sublane_align(dtype):
    # rows per 32-bit-deep sublane group: 8 for f32, 16 for bf16, 32 for int8
    return max(8, 32 // jnp.dtype(dtype).itemsize)


def _vmem_capacity_bytes():
    try:
        info = pltpu.get_tpu_info()
        for name in ("vmem_capacity_bytes", "vmem_size_bytes", "vmem_bytes"):
            cap = getattr(info, name, None)
            if cap:
                return int(cap)
    except Exception:
        pass
    return 128 << 20  # v5e / v6e default


def _pick_time_tile(t_out, cout, align, cap=16):
    """Output timesteps per grid step (cdiv grid; tail handled via padding)."""
    tt = max(1, min(t_out, cap))
    if tt >= t_out:
        return t_out  # single tile: output block == full dim, no packing constraint
    # multiple tiles: the (tt*Cout) output sublane block must be packing-aligned
    while tt > 1 and (tt * cout) % align:
        tt -= 1
    if (tt * cout) % align:
        return t_out  # fallback: one full tile (rare: Cout not packing-friendly)
    return tt


def _spec(block_shape, index_map, buffers=None):
    """BlockSpec; buffers=1 single-buffers a block that is resident across the grid."""
    if buffers is not None:
        try:
            return pl.BlockSpec(block_shape, index_map, pipeline_mode=pl.Buffered(buffers))
        except (TypeError, AttributeError):
            pass  # older jax: fall back to default double-buffering
    return pl.BlockSpec(block_shape, index_map)


# --------------------------------------------------------------------------- #
# Wrapper
# --------------------------------------------------------------------------- #
def conv3d_bn_relu(x, weight, bias, gamma, beta, run_mean, run_var,
                   *, kernel_size, stride, padding, eps=1e-5,
                   io_dtype=None, time_tile=16, max_hw_block=2048):
    """x: (B, T, Cin, H, W). Returns (B, T_out, Cout, H, W) in io_dtype (default x.dtype)."""
    kt, kh, kw = kernel_size
    pt, ph, pw = padding
    assert stride == 1 and kh == 1 and kw == 1 and ph == 0 and pw == 0, \
        "MotionNet Conv3D uses a temporal-only kernel (kt,1,1), stride 1"

    B, T, Cin, H, W = x.shape
    Cout = weight.shape[0]
    HW = H * W

    io_dtype = jnp.dtype(x.dtype if io_dtype is None else io_dtype)
    itemsize = io_dtype.itemsize
    align = _sublane_align(io_dtype)
    cin_pad = _round_up(Cin, align)          # aligned dynamic time-slice starts
    hw128 = _round_up(HW, 128)               # lane-dense stores

    Tp = T + 2 * pt
    T_out = Tp - kt + 1
    assert T_out >= 1

    tt = _pick_time_tile(T_out, Cout, align, time_tile)
    nt = _cdiv(T_out, tt)                    # cdiv grid; tail timesteps are computed into padding
    T_out_pad = nt * tt
    Tp_rows = T_out_pad + kt - 1             # padded-time length the kernel sees

    # ---- HW blocking: bound per-(b,hw) VMEM (v7x has only 64 MiB) ----
    vmem_cap = _vmem_capacity_bytes()
    budget = max(min(vmem_cap - (24 << 20), 90 << 20), 8 << 20)
    per_lane = (Tp_rows * cin_pad + 2 * tt * Cout) * itemsize   # x window (1-buf) + out (2-buf)
    hw_blk = (min(max_hw_block, hw128) // 128) * 128
    while hw_blk > 128 and hw_blk * per_lane > budget:
        hw_blk -= 128
    hw_pad = _round_up(hw128, hw_blk)
    n_hw = hw_pad // hw_blk

    # ---- input: ONE fused pad (time edges + cdiv tail + Cin/HW alignment) + cast ----
    xf = x.reshape(B, T, Cin, HW).astype(io_dtype)
    xf = jnp.pad(xf, ((0, 0),
                      (pt, pt + (T_out_pad - T_out)),
                      (0, cin_pad - Cin),
                      (0, hw_pad - HW)))
    xf = xf.reshape(B, Tp_rows * cin_pad, hw_pad)

    # ---- weights: fold BN scale, build the block-banded W_band once ----
    scale = gamma / jnp.sqrt(run_var + eps)
    w = jnp.transpose(weight[:, :, :, 0, 0], (0, 2, 1)) * scale[:, None, None]   # (Cout, kt, Cin)
    if cin_pad != Cin:
        w = jnp.pad(w, ((0, 0), (0, 0), (0, cin_pad - Cin)))
    w2 = w.reshape(Cout, kt * cin_pad).astype(jnp.float32)

    k_rows = (tt + kt - 1) * cin_pad
    w_band = jnp.zeros((tt * Cout, k_rows), jnp.float32)
    for i in range(tt):                                   # trace-time loop, tt <= 16
        w_band = jax.lax.dynamic_update_slice(w_band, w2, (i * Cout, i * cin_pad))
    w_band = w_band.astype(io_dtype)

    # folded BN shift (includes conv bias); kept f32 for the epilogue
    shift = (beta - run_mean * scale + bias * scale).astype(jnp.float32)
    shift_band = jnp.tile(shift, (tt,)).reshape(tt * Cout, 1)

    # ---- VMEM footprint -> generation-aware limit ----
    need = (Tp_rows * cin_pad * hw_blk * itemsize          # x window, single-buffered
            + 2 * tt * Cout * hw_blk * itemsize            # output tile, double-buffered
            + tt * Cout * k_rows * itemsize                # W_band, single-buffered
            + tt * Cout * 4                                # shift
            + (4 << 20))                                   # slack
    vmem_limit = int(max(min(max(need, 16 << 20), vmem_cap - (16 << 20), 100 << 20), 8 << 20))

    grid = (B, n_hw, nt)   # time innermost: x window stays resident across time tiles
    kernel = functools.partial(_conv3d_bn_relu_kernel, cin=cin_pad, kt=kt, tt=tt)

    out = pl.pallas_call(
        kernel,
        out_shape=jax.ShapeDtypeStruct((B, T_out_pad * Cout, hw_pad), io_dtype),
        grid_spec=pltpu.PrefetchScalarGridSpec(
            num_scalar_prefetch=0,
            grid=grid,
            in_specs=[
                # full flattened time window for this (b, hw) block; never re-fetched along time
                _spec((1, Tp_rows * cin_pad, hw_blk), lambda b, h, t: (b, 0, h), buffers=1),
                _spec((tt * Cout, k_rows), lambda b, h, t: (0, 0), buffers=1),
                _spec((tt * Cout, 1), lambda b, h, t: (0, 0), buffers=1),
            ],
            out_specs=pl.BlockSpec((1, tt * Cout, hw_blk), lambda b, h, t: (b, t, h)),
        ),
        compiler_params=pltpu.CompilerParams(
            # batch + HW blocks shard across TensorCores (v7x); time kept "arbitrary"
            # so the resident x window is not re-fetched per core along the time axis.
            dimension_semantics=("parallel", "parallel", "arbitrary"),
            vmem_limit_bytes=vmem_limit),
    )(xf, w_band, shift_band)

    # no-op slice / free reshape when HW % 128 == 0 and T_out % tt == 0
    out = out[:, :T_out * Cout, :HW].reshape(B, T_out, Cout, H, W)
    return out


# --------------------------------------------------------------------------- #
# Pure-JAX reference (mirrors the PyTorch forward, eval-mode BN)
# --------------------------------------------------------------------------- #
def _reference(x, weight, bias, gamma, beta, run_mean, run_var, padding, eps=1e-5):
    xc = jnp.transpose(x, (0, 2, 1, 3, 4))  # (B, C, T, H, W)
    y = jax.lax.conv_general_dilated(
        xc, weight, window_strides=(1, 1, 1),
        padding=[(padding[0], padding[0]), (padding[1], padding[1]), (padding[2], padding[2])],
        dimension_numbers=("NCDHW", "OIDHW", "NCDHW"))
    rs = lambda a: a.reshape(1, -1, 1, 1, 1)
    y = y + rs(bias)
    y = (y - rs(run_mean)) / jnp.sqrt(rs(run_var) + eps) * rs(gamma) + rs(beta)
    y = jnp.maximum(y, 0.0)
    return jnp.transpose(y, (0, 2, 1, 3, 4))


if __name__ == "__main__":
    # small shapes consistent with MotionNet's Conv3D usage
    B, T, Cin, Cout, H, W = 2, 8, 4, 8, 16, 16
    kernel_size = (3, 1, 1)
    stride = 1
    padding = (1, 0, 0)

    key = jax.random.PRNGKey(0)
    kx, kw_, kb, kg, kbe, km, kv = jax.random.split(key, 7)

    x = jax.random.normal(kx, (B, T, Cin, H, W), jnp.float32)
    weight = jax.random.normal(kw_, (Cout, Cin) + kernel_size, jnp.float32) * 0.1
    bias = jax.random.normal(kb, (Cout,), jnp.float32) * 0.1
    gamma = jax.random.uniform(kg, (Cout,), jnp.float32, 0.5, 1.5)
    beta = jax.random.normal(kbe, (Cout,), jnp.float32) * 0.1
    run_mean = jax.random.normal(km, (Cout,), jnp.float32) * 0.1
    run_var = jax.random.uniform(kv, (Cout,), jnp.float32, 0.5, 1.5)

    ref = _reference(x, weight, bias, gamma, beta, run_mean, run_var, padding)

    # f32 end-to-end (matches PyTorch default dtype)
    out = conv3d_bn_relu(x, weight, bias, gamma, beta, run_mean, run_var,
                         kernel_size=kernel_size, stride=stride, padding=padding)
    out = jax.block_until_ready(out)
    assert out.shape == ref.shape, (out.shape, ref.shape)
    assert jnp.max(jnp.abs(out - ref)) < 1e-4, float(jnp.max(jnp.abs(out - ref)))

    # bf16 I/O path (memory-bound win, biggest on bandwidth-poor v5e);
    # accumulation + BN/ReLU epilogue stay f32.
    out_bf16 = conv3d_bn_relu(x, weight, bias, gamma, beta, run_mean, run_var,
                              kernel_size=kernel_size, stride=stride, padding=padding,
                              io_dtype=jnp.bfloat16)
    out_bf16 = jax.block_until_ready(out_bf16)
    assert out_bf16.shape == ref.shape, (out_bf16.shape, ref.shape)
    err_bf16 = float(jnp.max(jnp.abs(out_bf16.astype(jnp.float32) - ref)))
    assert err_bf16 < 5e-2, err_bf16

    print("KERNEL_OK")
</pallas_src>

<mosaic_0001>
module attributes {stable_mosaic.version = 11 : i64} {
  func.func @_conv3d_bn_relu_kernel(%arg0: i32, %arg1: i32, %arg2: i32, %arg3: memref<1x80x256xf32, #tpu.memory_space<vmem>>, %arg4: memref<64x80xf32, #tpu.memory_space<vmem>>, %arg5: memref<64x1xf32, #tpu.memory_space<vmem>>, %arg6: memref<1x64x256xf32, #tpu.memory_space<vmem>>) attributes {dimension_semantics = [#tpu.dimension_semantics<parallel>, #tpu.dimension_semantics<parallel>, #tpu.dimension_semantics<arbitrary>], iteration_bounds = array<i64: 2, 1, 1>, scalar_prefetch = 0 : i64, scratch_operands = 0 : i64, tpu.core_type = #tpu.core_type<tc>, window_params = [{pipeline_mode = #tpu.pipeline_mode<synchronous>, transform_indices = @transform_0, window_bounds = array<i64: 1, 80, 256>}, {pipeline_mode = #tpu.pipeline_mode<synchronous>, transform_indices = @transform_1, window_bounds = array<i64: 64, 80>}, {pipeline_mode = #tpu.pipeline_mode<synchronous>, transform_indices = @transform_2, window_bounds = array<i64: 64, 1>}, {transform_indices = @transform_3, window_bounds = array<i64: 1, 64, 256>}]} {
    %c64_i32 = arith.constant 64 : i32
    %0 = arith.muli %arg2, %c64_i32 : i32
    %1 = tpu.assume_multiple %0, 8 : i32
    %c0 = arith.constant 0 : index
    %2 = arith.index_cast %1 : i32 to index
    %c0_0 = arith.constant 0 : index
    %3 = vector.load %arg3[%c0, %2, %c0_0] : memref<1x80x256xf32, #tpu.memory_space<vmem>>, vector<1x80x256xf32>
    %4 = vector.shape_cast %3 : vector<1x80x256xf32> to vector<80x256xf32>
    %c0_1 = arith.constant 0 : index
    %c0_2 = arith.constant 0 : index
    %5 = vector.load %arg4[%c0_1, %c0_2] : memref<64x80xf32, #tpu.memory_space<vmem>>, vector<64x80xf32>
    %cst = arith.constant dense<0.000000e+00> : vector<64x256xf32>
    %6 = tpu.matmul %5, %4, %cst {dimension_numbers = #tpu.dot_dimension_numbers<[1], [0], [0], [1], [0, 0, 1, 1], [], []>} : vector<64x80xf32>, vector<80x256xf32>, vector<64x256xf32> -> vector<64x256xf32>
    %c0_3 = arith.constant 0 : index
    %c0_4 = arith.constant 0 : index
    %7 = vector.load %arg5[%c0_3, %c0_4] : memref<64x1xf32, #tpu.memory_space<vmem>>, vector<64x1xf32>
    %8 = vector.broadcast %7 : vector<64x1xf32> to vector<64x256xf32>
    %9 = arith.addf %6, %8 : vector<64x256xf32>
    %cst_5 = arith.constant 0.000000e+00 : f32
    %10 = vector.broadcast %cst_5 : f32 to vector<64x256xf32>
    %11 = arith.maximumf %9, %10 : vector<64x256xf32>
    %c0_6 = arith.constant 0 : index
    %c0_7 = arith.constant 0 : index
    %c0_8 = arith.constant 0 : index
    %12 = vector.load %arg6[%c0_6, %c0_7, %c0_8] : memref<1x64x256xf32, #tpu.memory_space<vmem>>, vector<1x64x256xf32>
    %13 = vector.shape_cast %12 : vector<1x64x256xf32> to vector<64x256xf32>
    %14 = vector.shape_cast %11 : vector<64x256xf32> to vector<1x64x256xf32>
    tpu.vector_store %arg6[%c0_6, %c0_7, %c0_8], %14 {strides = array<i32>} : memref<1x64x256xf32, #tpu.memory_space<vmem>>, vector<1x64x256xf32>,
    return
  }
  func.func @transform_0(%arg0: i32, %arg1: i32, %arg2: i32) -> (i32, i32, i32) {
    %c0_i32 = arith.constant 0 : i32
    %c0_i32_0 = arith.constant 0 : i32
    return %arg0, %c0_i32, %arg1 : i32, i32, i32
  }
  func.func @transform_1(%arg0: i32, %arg1: i32, %arg2: i32) -> (i32, i32) {
    %c0_i32 = arith.constant 0 : i32
    %c0_i32_0 = arith.constant 0 : i32
    %c0_i32_1 = arith.constant 0 : i32
    return %c0_i32, %c0_i32_0 : i32, i32
  }
  func.func @transform_2(%arg0: i32, %arg1: i32, %arg2: i32) -> (i32, i32) {
    %c0_i32 = arith.constant 0 : i32
    %c0_i32_0 = arith.constant 0 : i32
    %c0_i32_1 = arith.constant 0 : i32
    return %c0_i32, %c0_i32_0 : i32, i32
  }
  func.func @transform_3(%arg0: i32, %arg1: i32, %arg2: i32) -> (i32, i32, i32) {
    %c0_i32 = arith.constant 0 : i32
    return %arg0, %arg2, %arg1 : i32, i32, i32
  }
}

</mosaic_0001>

<bundles_post_ra>
// kernel: tpu_custom_call.1
= control target key start
LH: loop header
LB: loop body
LE: loop exit
PB: predicated region body
PF: predicated region fallthrough
CT: control target
= control target key end

     0   :  { %8 = vsyncpa [#allocation3], 0  ;;  %s1011_s0 = inlined_call_operand.hbm [shape: f32[2,80,256], index: 0, kind: input, shape index: {}]   ;;  %s1012_s1 = inlined_call_operand.vmem [shape: f32[64,80], index: 1, kind: input, shape index: {}]   ;;  %s1013_s2 = inlined_call_operand.vmem [shape: f32[64,1], index: 2, kind: input, shape index: {}]   ;;  %s1014_s3 = inlined_call_operand.hbm [shape: f32[2,64,256], index: 3, kind: output, shape index: {}]  }
   0x1   :  { %9 = vsyncpa [#allocation4], 0 }
   0x2   :  { %11 = vsyncpa [#allocation4 + $0x1], 0  ;;  %s790_s12 = smov 0   ;;  %s792_s13 = smov 0  }
   0x3   :  { %s794_s14 = smov 0   ;;  %s796_s15 = smov 0  }
   0x4   :  { %s798_s16 = smov 0   ;;  %s800_s17 = smov 0  }
   0x5 LB: > { %s531_s18 = sadd.s32 4294967295, %s762_s17   ;;  %s532_s19 = sadd.s32 4294967294, %s762_s17   ;;  %s762_s17 = sphi %s800_s17, %s17_s17   ;;  %s758_s16 = sphi %s798_s16, %s1024_s16   ;;  %s754_s15 = sphi %s796_s15, %s1023_s15   ;;  %s750_s14 = sphi %s794_s14, %s1022_s14   ;;  %s746_s13 = sphi %s792_s13, %s1021_s13   ;;  %s742_s12 = sphi %s790_s12, %s1020_s12  }
   0x6   : > { %s36_s20 = sadd.s32 1, %s758_s16  ;;  %s45_s21 = sadd.s32 1, %s750_s14 }
   0x7   : > { %p38_p0 = scmp.ge.s32.totalorder %s36_s20, 2  ;;  %p58_p1 = scmp.ne.s32.totalorder %s746_s13, %s742_s12 }
   0x8   : > { %p127_p2 = scmp.ne.s32.totalorder %s750_s14, %s746_s13  ;;  %p59_p3 = scmp.eq.s32.totalorder %s531_s18, 0 }
   0x9   : > { %s1026_s20 = smov (%p38_p0, %s36_s20), 0  ;;  %p128_p4 = scmp.eq.s32.totalorder %s531_s18, 1 }
   0xa   : > { %s40_s22 = ssub.s32 %s758_s16, %s1026_s20  ;;  %p134_p5 = scmp.eq.s32.totalorder %s532_s19, 1 }
   0xb   : > { %p43_p6 = scmp.eq.s32.totalorder %s40_s22, 0  ;;  %p832_p7 = por %p128_p4, %p127_p2 }
   0xc   : > { %p839_p8 = por %p134_p5, %p58_p1  ;;  %p533_p9 = scmp.ge.s32.totalorder %s762_s17, 1 }
   0xd   : > { %s845_s25 = scalar_select %p43_p6, %s750_s14, %s45_s21  }
   0xe   : > { %p141_p10 = scmp.lt.s32.totalorder %s762_s17, 3  ;;  %s579_s26 = smul.u32 160, %s754_s15 }
   0xf   : > { %p852_p11 = por %p59_p3, %p58_p1  ;;  %s764_s6 = smov [#allocation2]  }
  0x10   : > { %p856_p12 = pnand %p533_p9, %p141_p10  ;;  %s156_s4 = scalar_lea.hbm %s1011_s0, %s579_s26 }
  0x11   : > { %s157_s5 = sshll.u32 %s156_s4, 4  ;;  %s159_s7 = sshll.u32 %s764_s6, 4  ;;  %s158_s5 = int_to_ptr.hbm [resolvable:$true] %s157_s5  ;;  %s160_s7 = int_to_ptr.vmem [resolvable:$true] %s159_s7 }
  0x12   : > { %p584_p13 = pneg %p856_p12  ;;  %s650_s9 = sshra.s32 %s158_s5, 4  ;;  %s651_s9 = int_to_ptr.hbm [resolvable:$true] %s650_s9 }
  0x13   : > { %s652_s10 = scalar_lea.hbm %s651_s9, 160  ;;  %s657_s19 = scalar_lea.hbm %s1011_s0, 320 }
  0x14   : > { %p867_p0 = pnand %p584_p13, %p852_p11  ;;  %p653_p1 = scmp.ne.s32.totalorder %s651_s9, %s652_s10 }
  0x15   : > { %p658_p5 = scmp.lt.s32.totalorder %s651_s9, %s1011_s0  ;;  %p659_p6 = scmp.lt.s32.totalorder %s657_s19, %s652_s10 }
  0x16   : > { %p654_p2 = pneg %p867_p0 }
  0x17   : > { %p660_p9 = por %p659_p6, %p658_p5 }
  0x18   : > { %p655_p3 = pnand %p654_p2, %p653_p1 }
  0x1a   : > { %p656_p4 = pneg %p655_p3 }
  0x1c   : > { %p661_p10 = pnand %p660_p9, %p656_p4 }
  0x1e   : > { %664 = shalt.err (!%p661_p10)
}
  0x1f   : > { %s765_s26 = smov 256   ;;  %s766_s29 = smov 16  }
  0x20   : > { %587 = dma.hbm_to_vmem [thread:$0]  (!%p867_p0), %s158_s5, 2560, %s160_s7, [#allocation3], %s765_s26, %s765_s26, %s766_s29  }
  0x21   : > { %181 = sbr.rel (%p856_p12) target bundleno = 227 (0xe3), region = 32 }
  0x26   : > { %733 = dma.done.wait (%p852_p11), [#allocation3], 2560  }
  0x27   : > { %735 = vsyncadd (%p852_p11), [#allocation3], 4294964736  ;;  %v767_v0 = vmov 0   ;;  %v228_v1 = vld [vmem:[#allocation2 + $0x90] sm:$0xff]  ;;  %v229_v2 = vld [vmem:[#allocation2 + $0x98] sm:$0xff]  ;;  %vm286_vm0 = vcmask 654336  }
  0x28   : > { %648 = vset.pattern.permute.xlu1 %v767_v0  ;;  %647 = vset.pattern.permute.xlu0 %v767_v0  ;;  %v226_v3 = vld [vmem:[#allocation2 + $0x80] sm:$0xff]  ;;  %v227_v4 = vld [vmem:[#allocation2 + $0x88] sm:$0xff]  ;;  %v224_v5 = vld [vmem:[#allocation2 + $0x70] sm:$0xff]  ;;  %s198_s26 = sand.u32 1, %s746_s13   ;;  %s558_s28 = sshll.u32 %s754_s15, 7 }
  0x29   : > { %649 = vset.pattern.permute.xlu2 %v767_v0  ;;  %317 = vmatpush.msra.mxu0 %v228_v1  ;;  %v225_v6 = vld [vmem:[#allocation2 + $0x78] sm:$0xff]  ;;  %v222_v7 = vld [vmem:[#allocation2 + $0x60] sm:$0xff]  ;;  %v223_v8 = vld [vmem:[#allocation2 + $0x68] sm:$0xff]  ;;  %s536_s29 = sshll.u32 %s198_s26, 7  ;;  %s442_s5 = scalar_lea.hbm %s1014_s3, %s558_s28 }
  0x2a   : > { %559 = vmatpush.msra.mxu2 %v228_v1  ;;  %358 = vmatpush.msra.mxu1 %v229_v2  ;;  %v220_v9 = vld [vmem:[#allocation2 + $0x50] sm:$0xff]  ;;  %v221_v10 = vld [vmem:[#allocation2 + $0x58] sm:$0xff]  ;;  %v218_v11 = vld [vmem:[#allocation2 + $0x40] sm:$0xff]  ;;  %s954_s27 = scalar_lea.vmem [#allocation5], %s536_s29  ;;  %s445_s6 = sshll.u32 %s442_s5, 4  ;;  %s446_s6 = int_to_ptr.hbm [resolvable:$true] %s445_s6 }
  0x2b   : > { %569 = vmatpush.msra.mxu3 %v229_v2  ;;  %318 = vmatpush.msra.mxu0 %v226_v3  ;;  %v219_v12 = vld [vmem:[#allocation2 + $0x48] sm:$0xff]  ;;  %v216_v13 = vld [vmem:[#allocation2 + $0x30] sm:$0xff]  ;;  %v217_v14 = vld [vmem:[#allocation2 + $0x38] sm:$0xff]  ;;  %s443_s15 = sshll.u32 %s954_s27, 4  ;;  %s426_s7 = scalar_lea.sflag [#allocation4], %s198_s26  ;;  %s444_s15 = int_to_ptr.vmem [resolvable:$true] %s443_s15 }
  0x2c   : > { %560 = vmatpush.msra.mxu2 %v226_v3  ;;  %359 = vmatpush.msra.mxu1 %v227_v4  ;;  %v214_v15 = vld [vmem:[#allocation2 + $0x20] sm:$0xff]  ;;  %v215_v16 = vld [vmem:[#allocation2 + $0x28] sm:$0xff]  ;;  %v212_v17 = vld [vmem:[#allocation2 + $0x10] sm:$0xff]  ;;  %s694_s8 = sshra.s32 %s446_s6, 4  ;;  %s700_s18 = scalar_lea.hbm %s1014_s3, 256  ;;  %s695_s8 = int_to_ptr.hbm [resolvable:$true] %s694_s8 }
  0x2d   : > { %570 = vmatpush.msra.mxu3 %v227_v4  ;;  %319 = vmatpush.msra.mxu0 %v224_v5  ;;  %v213_v18 = vld [vmem:[#allocation2 + $0x18] sm:$0xff]  ;;  %v210_v19 = vld [vmem:[#allocation2] sm:$0xff]  ;;  %v211_v20 = vld [vmem:[#allocation2 + $0x8] sm:$0xff]  ;;  %s696_s9 = scalar_lea.hbm %s695_s8, 128  ;;  %p701_p0 = scmp.lt.s32.totalorder %s695_s8, %s1014_s3 }
  0x2e   : > { %561 = vmatpush.msra.mxu2 %v224_v5  ;;  %360 = vmatpush.msra.mxu1 %v225_v6  ;;  %v230_v21 = vld [vmem:[%s1012_s1] sm:$0xff]  ;;  %v240_v23 = vld [vmem:[%s1013_s2 + $0x10] sm:$0xff]  ;;  %v231_v26 = vld [vmem:[%s1012_s1 + $0x8] sm:$0xff]  ;;  %p697_p11 = scmp.ne.s32.totalorder %s695_s8, %s696_s9  ;;  %p702_p1 = scmp.lt.s32.totalorder %s700_s18, %s696_s9 }
  0x2f   : > { %571 = vmatpush.msra.mxu3 %v225_v6  ;;  %320 = vmatpush.msra.mxu0 %v222_v7  ;;  %v234_v22 = vld [vmem:[%s1012_s1 + $0x20] sm:$0xff]  ;;  %v235_v27 = vld [vmem:[%s1012_s1 + $0x28] sm:$0xff]  ;;  %v241_v28 = vld [vmem:[%s1013_s2 + $0x18] sm:$0xff] }
  0x30   : > { %562 = vmatpush.msra.mxu2 %v222_v7  ;;  %361 = vmatpush.msra.mxu1 %v223_v8  ;;  %v238_v24 = vld [vmem:[%s1013_s2] sm:$0xff]  ;;  %v239_v29 = vld [vmem:[%s1013_s2 + $0x8] sm:$0xff]  ;;  %v232_v31 = vld [vmem:[%s1012_s1 + $0x10] sm:$0xff]  ;;  %p698_p12 = pnand %p697_p11, %p832_p7  ;;  %p703_p2 = por %p702_p1, %p701_p0 }
  0x31   : > { %572 = vmatpush.msra.mxu3 %v223_v8  ;;  %321 = vmatpush.msra.mxu0 %v220_v9  ;;  %v242_v25 = vld [vmem:[%s1013_s2 + $0x20] sm:$0xff]  ;;  %v243_v30 = vld [vmem:[%s1013_s2 + $0x28] sm:$0xff]  ;;  %v236_v32 = vld [vmem:[%s1012_s1 + $0x30] sm:$0xff] }
  0x32   : > { %563 = vmatpush.msra.mxu2 %v220_v9  ;;  %362 = vmatpush.msra.mxu1 %v221_v10  ;;  %v245_v33 = vld [vmem:[%s1013_s2 + $0x38] sm:$0xff]  ;;  %v244_v34 = vld [vmem:[%s1013_s2 + $0x30] sm:$0xff]  ;;  %p699_p13 = pneg %p698_p12 }
  0x33   : > { %573 = vmatpush.msra.mxu3 %v221_v10  ;;  %322 = vmatpush.msra.mxu0 %v218_v11  ;;  %v233_v35 = vld [vmem:[%s1012_s1 + $0x18] sm:$0xff] }
  0x34   : > { %564 = vmatpush.msra.mxu2 %v218_v11  ;;  %363 = vmatpush.msra.mxu1 %v219_v12  ;;  %v237_v36 = vld [vmem:[%s1012_s1 + $0x38] sm:$0xff]  ;;  %p704_p3 = pnand %p703_p2, %p699_p13 }
  0x35   : > { %574 = vmatpush.msra.mxu3 %v219_v12  ;;  %323 = vmatpush.msra.mxu0 %v216_v13 }
  0x36   : > { %565 = vmatpush.msra.mxu2 %v216_v13  ;;  %364 = vmatpush.msra.mxu1 %v217_v14 }
  0x37   : > { %575 = vmatpush.msra.mxu3 %v217_v14  ;;  %324 = vmatpush.msra.mxu0 %v214_v15 }
  0x38   : > { %566 = vmatpush.msra.mxu2 %v214_v15  ;;  %365 = vmatpush.msra.mxu1 %v215_v16 }
  0x39   : > { %576 = vmatpush.msra.mxu3 %v215_v16  ;;  %325 = vmatpush.msra.mxu0 %v212_v17 }
  0x3a   : > { %567 = vmatpush.msra.mxu2 %v212_v17  ;;  %366 = vmatpush.msra.mxu1 %v213_v18 }
  0x3b   : > { %577 = vmatpush.msra.mxu3 %v213_v18  ;;  %326 = vmatpush.msra.mxu0 %v210_v19 }
  0x3c   : > { %568 = vmatpush.msra.mxu2 %v210_v19  ;;  %367 = vmatpush.msra.mxu1 %v211_v20 }
  0x3d   : > { %578 = vmatpush.msra.mxu3 %v211_v20  ;;  %537 = vmatmul.msk.f32.vlgmr.msra.gmra.mxu0 %vm286_vm0, %v230_v21 }
  0x3e   : > { %541 = vmatmul.msk.f32.vlgmr.msra.gmra.mxu2 %vm286_vm0, %v234_v22  ;;  %545 = vmatmul.msk.f32.vlgmr.msra.gmra.mxu1 %vm286_vm0, %v230_v21 }
  0x3f   : > { %549 = vmatmul.msk.f32.vlgmr.msra.gmra.mxu3 %vm286_vm0, %v234_v22  ;;  %258 = vperm.xlu1 %648, %v240_v23  }
  0x40   : > { %248 = vperm.xlu0 %647, %v238_v24   ;;  %268 = vperm.xlu2 %649, %v242_v25  }
  0x45   : > { %538 = vmatmul.msk.f32.gmra.mxu0 %vm286_vm0, %v231_v26 }
  0x46   : > { %542 = vmatmul.msk.f32.gmra.mxu2 %vm286_vm0, %v235_v27  ;;  %546 = vmatmul.msk.f32.gmra.mxu1 %vm286_vm0, %v231_v26 }
  0x47   : > { %550 = vmatmul.msk.f32.gmra.mxu3 %vm286_vm0, %v235_v27  ;;  %263 = vperm.xlu1 %648, %v241_v28  }
  0x48   : > { %253 = vperm.xlu0 %647, %v239_v29   ;;  %273 = vperm.xlu2 %649, %v243_v30  }
  0x4d   : > { %539 = vmatmul.msk.f32.gmra.mxu0 %vm286_vm0, %v232_v31 }
  0x4e   : > { %543 = vmatmul.msk.f32.gmra.mxu2 %vm286_vm0, %v236_v32  ;;  %547 = vmatmul.msk.f32.gmra.mxu1 %vm286_vm0, %v232_v31 }
  0x4f   : > { %551 = vmatmul.msk.f32.gmra.mxu3 %vm286_vm0, %v236_v32  ;;  %283 = vperm.xlu1 %648, %v245_v33  }
  0x50   : > { %278 = vperm.xlu0 %647, %v244_v34  }
  0x55   : > { %540 = vmatmul.msk.f32.gmra.mxu0 %vm286_vm0, %v233_v35 }
  0x56   : > { %544 = vmatmul.msk.f32.gmra.mxu2 %vm286_vm0, %v237_v36  ;;  %548 = vmatmul.msk.f32.gmra.mxu1 %vm286_vm0, %v233_v35 }
  0x57   : > { %552 = vmatmul.msk.f32.gmra.mxu3 %vm286_vm0, %v237_v36 }
  0x9a   : > { %v269_v42 = vpop.permute.xlu2 %268 }
  0xa2   : > { %v274_v59 = vpop.permute.xlu2 %273 }
  0xb1   : > { %v259_v54 = vpop.permute.xlu1 %258 }
  0xb2   : > { %v249_v37 = vpop.permute.xlu0 %248 }
  0xb9   : > { %v264_v7 = vpop.permute.xlu1 %263 }
  0xba   : > { %v328_v38 = vpop.f32.mrf.mxu0  ;;  %v254_v48 = vpop.permute.xlu0 %253 }
  0xbb   : > { %v329_v39 = vadd.f32 %v328_v38, %v249_v37  ;;  %v369_v40 = vpop.f32.mrf.mxu1 }
  0xbc   : > { %v370_v41 = vadd.f32 %v369_v40, %v249_v37 }
  0xbd   : > { %v393_v43 = vmax.f32 %v329_v39, 0.0 }
  0xbe   : > { %v394_v44 = vmax.f32 %v370_v41, 0.0 }
  0xbf   : > { %409 = vst [vmem:[%s954_s27] sm:$0xff] %v393_v43 }
  0xc0   : > { %410 = vst [vmem:[%s954_s27 + $0x8] sm:$0xff] %v394_v44 }
  0xc1   : > { %v340_v45 = vpop.f32.mrf.mxu2  ;;  %v284_v22 = vpop.permute.xlu1 %283 }
  0xc2   : > { %v341_v46 = vadd.f32 %v340_v45, %v269_v42  ;;  %v381_v47 = vpop.f32.mrf.mxu3  ;;  %v331_v50 = vpop.f32.mrf.mxu0 }
  0xc3   : > { %v382_v49 = vadd.f32 %v381_v47, %v269_v42  ;;  %v332_v52 = vadd.f32 %v331_v50, %v254_v48  ;;  %v372_v53 = vpop.f32.mrf.mxu1  ;;  %v279_v9 = vpop.permute.xlu0 %278 }
  0xc4   : > { %v401_v51 = vmax.f32 %v341_v46, 0.0  ;;  %v373_v56 = vadd.f32 %v372_v53, %v254_v48 }
  0xc5   : > { %v402_v55 = vmax.f32 %v382_v49, 0.0  ;;  %v395_v57 = vmax.f32 %v332_v52, 0.0 }
  0xc6   : > { %417 = vst [vmem:[%s954_s27 + $0x40] sm:$0xff] %v401_v51  ;;  %v396_v58 = vmax.f32 %v373_v56, 0.0 }
  0xc7   : > { %418 = vst [vmem:[%s954_s27 + $0x48] sm:$0xff] %v402_v55 }
  0xc8   : > { %411 = vst [vmem:[%s954_s27 + $0x10] sm:$0xff] %v395_v57 }
  0xc9   : > { %412 = vst [vmem:[%s954_s27 + $0x18] sm:$0xff] %v396_v58  ;;  %v343_v60 = vpop.f32.mrf.mxu2 }
  0xca   : > { %v344_v61 = vadd.f32 %v343_v60, %v274_v59  ;;  %v384_v62 = vpop.f32.mrf.mxu3  ;;  %v334_v0 = vpop.f32.mrf.mxu0 }
  0xcb   : > { %v385_v63 = vadd.f32 %v384_v62, %v274_v59  ;;  %v335_v2 = vadd.f32 %v334_v0, %v259_v54  ;;  %v375_v3 = vpop.f32.mrf.mxu1 }
  0xcc   : > { %v403_v1 = vmax.f32 %v344_v61, 0.0  ;;  %v376_v5 = vadd.f32 %v375_v3, %v259_v54 }
  0xcd   : > { %v404_v4 = vmax.f32 %v385_v63, 0.0  ;;  %v397_v6 = vmax.f32 %v335_v2, 0.0 }
  0xce   : > { %419 = vst [vmem:[%s954_s27 + $0x50] sm:$0xff] %v403_v1  ;;  %v398_v8 = vmax.f32 %v376_v5, 0.0 }
  0xcf   : > { %420 = vst [vmem:[%s954_s27 + $0x58] sm:$0xff] %v404_v4 }
  0xd0   : > { %413 = vst [vmem:[%s954_s27 + $0x20] sm:$0xff] %v397_v6 }
  0xd1   : > { %414 = vst [vmem:[%s954_s27 + $0x28] sm:$0xff] %v398_v8  ;;  %v346_v10 = vpop.f32.mrf.mxu2 }
  0xd2   : > { %v347_v11 = vadd.f32 %v346_v10, %v279_v9  ;;  %v387_v12 = vpop.f32.mrf.mxu3  ;;  %v337_v14 = vpop.f32.mrf.mxu0 }
  0xd3   : > { %v388_v13 = vadd.f32 %v387_v12, %v279_v9  ;;  %v338_v16 = vadd.f32 %v337_v14, %v264_v7  ;;  %v378_v17 = vpop.f32.mrf.mxu1 }
  0xd4   : > { %v405_v15 = vmax.f32 %v347_v11, 0.0  ;;  %v379_v19 = vadd.f32 %v378_v17, %v264_v7 }
  0xd5   : > { %v406_v18 = vmax.f32 %v388_v13, 0.0  ;;  %v399_v20 = vmax.f32 %v338_v16, 0.0 }
  0xd6   : > { %421 = vst [vmem:[%s954_s27 + $0x60] sm:$0xff] %v405_v15  ;;  %v400_v21 = vmax.f32 %v379_v19, 0.0 }
  0xd7   : > { %422 = vst [vmem:[%s954_s27 + $0x68] sm:$0xff] %v406_v18 }
  0xd8   : > { %415 = vst [vmem:[%s954_s27 + $0x30] sm:$0xff] %v399_v20 }
  0xd9   : > { %416 = vst [vmem:[%s954_s27 + $0x38] sm:$0xff] %v400_v21  ;;  %v349_v23 = vpop.f32.mrf.mxu2 }
  0xda   : > { %v350_v24 = vadd.f32 %v349_v23, %v284_v22  ;;  %v390_v25 = vpop.f32.mrf.mxu3 }
  0xdb   : > { %v391_v26 = vadd.f32 %v390_v25, %v284_v22 }
  0xdc   : > { %v407_v27 = vmax.f32 %v350_v24, 0.0 }
  0xdd   : > { %v408_v28 = vmax.f32 %v391_v26, 0.0 }
  0xde   : > { %423 = vst [vmem:[%s954_s27 + $0x70] sm:$0xff] %v407_v27 }
  0xdf   : > { %424 = vst [vmem:[%s954_s27 + $0x78] sm:$0xff] %v408_v28 }
  0xe0   : > { %707 = shalt.err (!%p704_p3)
}
  0xe1   : > { %s768_s22 = smov 256   ;;  %s769_s26 = smov 16  }
  0xe2   : > { %582 = dma.vmem_to_hbm [thread:$0]  (%p832_p7), %s444_s15, 2048, %s446_s6, %s426_s7, %s768_s22, %s768_s22, %s769_s26  }
  0xe3 PF: > { %p592_p4 = scmp.ge.s32.totalorder %s762_s17, 2  ;;  %s460_s29 = sand.u32 1, %s742_s12  }
  0xe4   : > { %s461_s27 = scalar_lea.sflag [#allocation4], %s460_s29 }
  0xe5   : > { %p589_p5 = pnand %p592_p4, %p839_p8 }
  0xe7   : > { %p590_p6 = pneg %p589_p5 }
  0xe9   : > { %737 = dma.done.wait (%p590_p6), %s461_s27, 2048  }
  0xea   : > { %739 = vsyncadd (%p590_p6), %s461_s27, 4294965248  ;;  %s17_s17 = sadd.s32 1, %s762_s17   ;;  %s1020_s12 = smov %s746_s13 }
  0xeb   : > { %p14_p9 = scmp.ge.s32.totalorder %s17_s17, 4   ;;  %s1021_s13 = smov %s750_s14 }
  0xec   : > { %s1022_s14 = smov %s845_s25  ;;  %s1023_s15 = smov %s758_s16 }
  0xed   : > { %s1024_s16 = smov %s1026_s20  ;;  %16 = sbr.rel (!%p14_p9) target bundleno = 5 (0x5), region = 71 }
  0xf2   :  { %467 = vsyncpa [#allocation3], 1 }
  0xf3   :  { %469 = vsyncpa [#allocation3 + $0x1], 1 }
  0xf4   :  { %470 = vsyncpa [#allocation4], 1 }
  0xf5   :  { %472 = vsyncpa [#allocation4 + $0x1], 1 }

</bundles_post_ra>
